<compile_context>
chip_gen: v5e
topology: v5e:2x2
jax: 0.10.0
libtpu: 0.0.40
codegen_flags: <defaults>
</compile_context>

<pallas_src>
import functools

import jax
import jax.numpy as jnp
from jax.experimental import pallas as pl
from jax.experimental.pallas import tpu as pltpu

BN_EPS = 1e-5
LEAKY_SLOPE = 0.01                      # PyTorch nn.LeakyReLU default
_TILE_VMEM_BUDGET = 6 * 1024 * 1024     # per-step payload incl. f32 temporaries
_MAX_TILE = 16 * 1024                   # lane cap (keeps v7x's 64 MiB VMEM comfortable)
_VMEM_LIMIT = 32 * 1024 * 1024


def _stats_kernel(x_ref, mom_ref):
    """Per-(batch, HW-chunk) moments of x: mom = [x x^T | sum_t x] of shape (Cin, Cin+1)."""
    xt = x_ref[0].astype(jnp.float32)                          # (Cin, T)
    gram = jax.lax.dot_general(                                # (Cin, Cin): contract T (lane) on MXU
        xt, xt, (((1,), (1,)), ((), ())), preferred_element_type=jnp.float32)
    sumx = jnp.sum(xt, axis=-1, keepdims=True)                 # (Cin, 1), XLU reduce
    mom_ref[0, 0] = jnp.concatenate([gram, sumx], axis=1)      # (Cin, Cin+1)


def _apply_kernel(x_ref, w_ref, gamma_ref, beta_ref, mom_ref, o_ref, *, inv_count, cin):
    # ---- fused BN epilogue (Cout scalars; mom block is resident, fetched once) ----
    mom = jnp.sum(mom_ref[...], axis=(0, 1))                   # (Cin, Cin+1) f32
    w = w_ref[...]                                             # (Cout, Cin)  f32
    wm = jnp.dot(w, mom, preferred_element_type=jnp.float32)   # (Cout, Cin+1)
    sum_y = wm[:, cin:cin + 1]                                 # (Cout, 1) = W @ sum_x
    ssq_y = jnp.sum(wm[:, :cin] * w, axis=-1, keepdims=True)   # (Cout, 1) = diag(W G W^T)
    mean = sum_y * inv_count
    var = jnp.maximum(ssq_y * inv_count - mean * mean, 0.0)    # biased (train-mode) variance
    inv_std = jax.lax.rsqrt(var + BN_EPS)                      # EUP
    scale = gamma_ref[...] * inv_std                           # (Cout, 1)
    shift = beta_ref[...] - mean * scale
    # ---- fold BN scale into the weights; per-element work = one add + LeakyReLU ----
    ws = (w * scale).astype(x_ref.dtype)                       # (Cout, Cin)
    z = jnp.dot(ws, x_ref[0], preferred_element_type=jnp.float32) + shift   # (Cout, T)
    z = jnp.where(z >= 0.0, z, LEAKY_SLOPE * z)                # LeakyReLU(0.01)
    o_ref[0] = z.astype(o_ref.dtype)


def _pick_hw_tile(hwp, cin, cout, itemsize):
    """Lane tile: multiple of 128 dividing hwp, <= hwp/2 (>= 2 parallel blocks for the two
    v7x TensorCores), capped so double-buffered x/out blocks plus in-kernel f32
    temporaries fit a conservative per-step VMEM budget."""
    if hwp <= 128:
        return hwp
    per_col = (2 * cin + 2 * cout) * itemsize + 2 * cout * 4   # in+out (x2 buf) + f32 temps
    cap = (_TILE_VMEM_BUDGET // per_col) // 128 * 128
    cap = max(128, min(cap, _MAX_TILE, (hwp // 2) // 128 * 128))
    t = cap
    while hwp % t != 0:
        t -= 128
    return t


def cov1_forward(x_nchw, weight, bias, gamma, beta, use_bn=True, use_relu=True):
    """x_nchw: (N, Cin, H, W); weight: (Cout, Cin, 1, 1); bias/gamma/beta: (Cout,)."""
    assert use_bn and use_relu, "kernel specialized to the default use_bn/use_relu=True path"
    del bias  # a per-channel conv bias is exactly cancelled by BatchNorm's mean subtraction

    N, Cin, H, W = x_nchw.shape
    Cout = weight.shape[0]
    HW = H * W
    count = N * HW                                             # true pixel count for BN stats

    io_dtype = x_nchw.dtype
    itemsize = jnp.dtype(io_dtype).itemsize
    x3 = x_nchw.reshape(N, Cin, HW)                            # free reshape, channel-minor GEMM layout

    # Pad the lane axis to a multiple of 128: zero columns add 0 to the moments and the
    # epilogue divides by the true count, so stats stay exact; padding is sliced off below.
    HWp = -(-HW // 128) * 128
    if HWp != HW:
        x3 = jnp.pad(x3, ((0, 0), (0, 0), (0, HWp - HW)))

    tile = _pick_hw_tile(HWp, Cin, Cout, itemsize)
    nt = HWp // tile
    grid = (N, nt)
    Rp = N * HWp

    w2 = weight.reshape(Cout, Cin).astype(jnp.float32)         # weights stay f32
    gamma2 = gamma.astype(jnp.float32).reshape(Cout, 1)
    beta2 = beta.astype(jnp.float32).reshape(Cout, 1)

    x_spec = pl.BlockSpec((1, Cin, tile), lambda n, t: (n, 0, t))
    mom_spec = pl.BlockSpec((1, 1, Cin, Cin + 1), lambda n, t: (n, t, 0, 0))

    # ---- pass 1: per-(batch, chunk) moments of x (pure streaming read, W-independent) ----
    mom = pl.pallas_call(
        _stats_kernel,
        out_shape=jax.ShapeDtypeStruct((N, nt, Cin, Cin + 1), jnp.float32),
        grid_spec=pltpu.PrefetchScalarGridSpec(
            num_scalar_prefetch=0,
            grid=grid,
            in_specs=[x_spec],
            out_specs=mom_spec),
        compiler_params=pltpu.CompilerParams(
            dimension_semantics=("parallel", "parallel"),
            vmem_limit_bytes=_VMEM_LIMIT),
        cost_estimate=pl.CostEstimate(
            flops=2 * Rp * Cin * (Cin + 1),
            transcendentals=0,
            bytes_accessed=Rp * Cin * itemsize + N * nt * Cin * (Cin + 1) * 4),
    )(x3)

    # Keep the resident pass-2 stats block tiny if the grid is huge (one cheap fusion;
    # at such sizes the launch overhead it re-introduces is negligible).
    if N * nt > 256:
        mom = jnp.sum(mom, axis=(0, 1), keepdims=True)

    full_mom_spec = pl.BlockSpec(mom.shape, lambda n, t: (0, 0, 0, 0))
    w_spec = pl.BlockSpec((Cout, Cin), lambda n, t: (0, 0))
    vec_spec = pl.BlockSpec((Cout, 1), lambda n, t: (0, 0))
    out_spec = pl.BlockSpec((1, Cout, tile), lambda n, t: (n, 0, t))

    # ---- pass 2: recompute the 1x1 GEMM with BN-scaled weights, fused BN + LeakyReLU ----
    apply_fn = functools.partial(_apply_kernel, inv_count=1.0 / float(count), cin=Cin)
    out3 = pl.pallas_call(
        apply_fn,
        out_shape=jax.ShapeDtypeStruct((N, Cout, HWp), io_dtype),
        grid_spec=pltpu.PrefetchScalarGridSpec(
            num_scalar_prefetch=0,
            grid=grid,
            in_specs=[x_spec, w_spec, vec_spec, vec_spec, full_mom_spec],
            out_specs=out_spec),
        compiler_params=pltpu.CompilerParams(
            dimension_semantics=("parallel", "parallel"),
            vmem_limit_bytes=_VMEM_LIMIT),
        cost_estimate=pl.CostEstimate(
            flops=2 * Rp * Cin * Cout + 4 * Rp * Cout,
            transcendentals=Cout * N * nt,
            bytes_accessed=Rp * (Cin + Cout) * itemsize + mom.size * 4),
    )(x3, w2, gamma2, beta2, mom)

    if HWp != HW:
        out3 = out3[:, :, :HW]
    return out3.reshape(N, Cout, H, W)                         # free reshape back to NCHW


def _reference(x, weight, bias, gamma, beta):
    # pure-JAX reference (f32), including the conv bias (cancelled by BN in the kernel)
    N, Cin, H, W = x.shape
    Cout = weight.shape[0]
    w = weight.reshape(Cout, Cin)
    y = jnp.einsum("oc,nchw->nohw", w, x) + bias[None, :, None, None]
    mean = jnp.mean(y, axis=(0, 2, 3), keepdims=True)
    var = jnp.mean((y - mean) ** 2, axis=(0, 2, 3), keepdims=True)
    y = (y - mean) / jnp.sqrt(var + BN_EPS)
    y = y * gamma[None, :, None, None] + beta[None, :, None, None]
    return jnp.where(y >= 0, y, LEAKY_SLOPE * y)


if __name__ == "__main__":
    key = jax.random.PRNGKey(0)
    k_x, k_w, k_b = jax.random.split(key, 3)

    # small shapes consistent with the module: batch=2, inp_dim=4, spatial=16, out_dim=8
    N, Cin, H, W, Cout = 2, 4, 16, 16, 8

    x = jax.random.normal(k_x, (N, Cin, H, W), dtype=jnp.float32)

    # deterministic parameter init (Conv2d weight/bias shapes from __init__)
    fan_in = Cin * 1 * 1
    bound = 1.0 / (fan_in ** 0.5)
    weight = jax.random.uniform(k_w, (Cout, Cin, 1, 1), minval=-bound, maxval=bound,
                                dtype=jnp.float32)
    bias = jax.random.uniform(k_b, (Cout,), minval=-bound, maxval=bound, dtype=jnp.float32)
    gamma = jnp.ones((Cout,), jnp.float32)   # BatchNorm2d affine defaults
    beta = jnp.zeros((Cout,), jnp.float32)

    out = cov1_forward(x, weight, bias, gamma, beta)
    out = jax.block_until_ready(out)

    ref = _reference(x, weight, bias, gamma, beta)
    assert out.shape == (N, Cout, H, W)
    assert jnp.max(jnp.abs(out - ref)) < 1e-4

    print("KERNEL_OK")
</pallas_src>

<mosaic_0001>
module attributes {stable_mosaic.version = 11 : i64} {
  func.func @_stats_kernel(%arg0: i32, %arg1: i32, %arg2: memref<1x4x128xf32, #tpu.memory_space<vmem>>, %arg3: memref<1x1x4x5xf32, #tpu.memory_space<vmem>>) attributes {dimension_semantics = [#tpu.dimension_semantics<parallel>, #tpu.dimension_semantics<parallel>], iteration_bounds = array<i64: 2, 2>, scalar_prefetch = 0 : i64, scratch_operands = 0 : i64, tpu.core_type = #tpu.core_type<tc>, window_params = [{transform_indices = @transform_0, window_bounds = array<i64: 1, 4, 128>}, {transform_indices = @transform_1, window_bounds = array<i64: 1, 1, 4, 5>}]} {
    %c0 = arith.constant 0 : index
    %c0_0 = arith.constant 0 : index
    %c0_1 = arith.constant 0 : index
    %0 = vector.load %arg2[%c0, %c0_0, %c0_1] : memref<1x4x128xf32, #tpu.memory_space<vmem>>, vector<1x4x128xf32>
    %1 = vector.shape_cast %0 : vector<1x4x128xf32> to vector<4x128xf32>
    %cst = arith.constant dense<0.000000e+00> : vector<4x4xf32>
    %2 = tpu.matmul %1, %1, %cst {dimension_numbers = #tpu.dot_dimension_numbers<[1], [1], [0], [0], [0, 0, 1, 0], [], []>} : vector<4x128xf32>, vector<4x128xf32>, vector<4x4xf32> -> vector<4x4xf32>
    %cst_2 = arith.constant dense<0.000000e+00> : vector<4xf32>
    %3 = vector.multi_reduction <add>, %1, %cst_2 [1] : vector<4x128xf32> to vector<4xf32>
    %4 = vector.shape_cast %3 : vector<4xf32> to vector<4x1xf32>
    %5 = tpu.concatenate %2, %4 in 1 : vector<4x4xf32>, vector<4x1xf32> -> vector<4x5xf32>
    %c0_3 = arith.constant 0 : index
    %c0_4 = arith.constant 0 : index
    %c0_5 = arith.constant 0 : index
    %c0_6 = arith.constant 0 : index
    %6 = vector.load %arg3[%c0_3, %c0_4, %c0_5, %c0_6] : memref<1x1x4x5xf32, #tpu.memory_space<vmem>>, vector<1x1x4x5xf32>
    %7 = vector.shape_cast %6 : vector<1x1x4x5xf32> to vector<4x5xf32>
    %8 = vector.shape_cast %5 : vector<4x5xf32> to vector<1x1x4x5xf32>
    tpu.vector_store %arg3[%c0_3, %c0_4, %c0_5, %c0_6], %8 {strides = array<i32>} : memref<1x1x4x5xf32, #tpu.memory_space<vmem>>, vector<1x1x4x5xf32>,
    return
  }
  func.func @transform_0(%arg0: i32, %arg1: i32) -> (i32, i32, i32) {
    %c0_i32 = arith.constant 0 : i32
    %c0_i32_0 = arith.constant 0 : i32
    return %arg0, %c0_i32, %arg1 : i32, i32, i32
  }
  func.func @transform_1(%arg0: i32, %arg1: i32) -> (i32, i32, i32, i32) {
    %c0_i32 = arith.constant 0 : i32
    %c0_i32_0 = arith.constant 0 : i32
    %c0_i32_1 = arith.constant 0 : i32
    return %arg0, %arg1, %c0_i32, %c0_i32_0 : i32, i32, i32, i32
  }
}

</mosaic_0001>

<bundles_post_ra>
// kernel: tpu_custom_call.1
= control target key start
LH: loop header
LB: loop body
LE: loop exit
PB: predicated region body
PF: predicated region fallthrough
CT: control target
= control target key end

     0   :  { %6 = vsyncpa [#allocation3], 0  ;;  %s659_s0 = inlined_call_operand.hbm [shape: f32[2,4,256], index: 0, kind: input, shape index: {}]   ;;  %s660_s1 = inlined_call_operand.hbm [shape: f32[2,2,4,5], index: 1, kind: output, shape index: {}]  }
   0x1   :  { %8 = vsyncpa [#allocation3 + $0x1], 0 }
   0x2   :  { %9 = vsyncpa [#allocation4], 0 }
   0x3   :  { %11 = vsyncpa [#allocation4 + $0x1], 0  ;;  %s517_s6 = smov 0   ;;  %s519_s7 = smov 0  }
   0x4   :  { %s521_s8 = smov 0   ;;  %s523_s9 = smov 0  }
   0x5   :  { %s525_s10 = smov 0   ;;  %s527_s11 = smov 0  }
   0x6   :  { %s529_s12 = smov 0   ;;  %s531_s13 = smov 0  }
   0x7 LB: > { %s284_s14 = sadd.s32 4294967295, %s505_s13   ;;  %s285_s15 = sadd.s32 4294967294, %s505_s13   ;;  %s505_s13 = sphi %s531_s13, %s17_s13   ;;  %s501_s12 = sphi %s529_s12, %s671_s12   ;;  %s497_s11 = sphi %s527_s11, %s670_s11   ;;  %s493_s10 = sphi %s525_s10, %s669_s10   ;;  %s489_s9 = sphi %s523_s9, %s668_s9   ;;  %s485_s8 = sphi %s521_s8, %s667_s8   ;;  %s481_s7 = sphi %s519_s7, %s666_s7   ;;  %s477_s6 = sphi %s517_s6, %s665_s6  }
   0x8   : > { %s26_s16 = sadd.s32 1, %s497_s11  ;;  %s29_s17 = sadd.s32 1, %s501_s12 }
   0x9   : > { %p27_p0 = scmp.ge.s32.totalorder %s26_s16, 2  ;;  %s38_s18 = sadd.s32 1, %s485_s8 }
   0xa   : > { %p45_p1 = scmp.ne.s32.totalorder %s485_s8, %s481_s7  ;;  %p46_p2 = scmp.eq.s32.totalorder %s505_s13, 0 }
   0xb   : > { %s673_s16 = smov (%p27_p0, %s26_s16), 0  ;;  %s675_s17 = smov (!%p27_p0, %s29_s17), %s501_s12 }
   0xc   : > { %s34_s19 = ssub.s32 %s497_s11, %s673_s16  ;;  %p570_p3 = por %p46_p2, %p45_p1 }
   0xd   : > { %p31_p4 = scmp.ge.s32.totalorder %s675_s17, 2  ;;  %p51_p5 = scmp.ne.s32.totalorder %s481_s7, %s477_s6 }
   0xe   : > { %p52_p6 = scmp.eq.s32.totalorder %s284_s14, 0  ;;  %p77_p7 = scmp.eq.s32.totalorder %s284_s14, 3 }
   0xf   : > { %s677_s17 = smov (%p31_p4, %s675_s17), 0  ;;  %p83_p10 = scmp.eq.s32.totalorder %s285_s15, 3 }
  0x10   : > { %p578_p8 = por %p52_p6, %p51_p5  ;;  %p582_p9 = por %p77_p7, %p45_p1 }
  0x11   : > { %s33_s23 = ssub.s32 %s501_s12, %s677_s17  ;;  %p588_p12 = por %p83_p10, %p51_p5 }
  0x12   : > { %s35_s24 = sor.u32 %s34_s19, %s33_s23  ;;  %p311_p13 = scmp.lt.s32.totalorder %s505_s13, 4 }
  0x13   : > { %p36_p11 = scmp.eq.s32.totalorder %s35_s24, 0  ;;  %s103_s26 = sand.u32 1, %s485_s8  }
  0x14   : > { %s288_s28 = sshll.u32 %s103_s26, 2  ;;  %s289_s29 = sshll.u32 %s501_s12, 1 }
  0x15   : > { %s595_s27 = scalar_select %p36_p11, %s485_s8, %s38_s18  }
  0x16   : > { %s111_s30 = sadd.s32 %s497_s11, %s289_s29  ;;  %s107_s2 = scalar_lea.vmem [#allocation2], %s288_s28 }
  0x17   : > { %s117_s3 = sshll.u32 %s107_s2, 4  ;;  %s290_s4 = sshll.u32 %s111_s30, 2  ;;  %s118_s3 = int_to_ptr.vmem [resolvable:$true] %s117_s3 }
  0x18   : > { %s113_s15 = scalar_lea.hbm %s659_s0, %s290_s4  ;;  %p304_p0 = pnand %p311_p13, %p570_p3 }
  0x19   : > { %s115_s19 = sshll.u32 %s113_s15, 4  ;;  %p291_p1 = scmp.ge.s32.totalorder %s505_s13, 1  ;;  %s116_s19 = int_to_ptr.hbm [resolvable:$true] %s115_s19 }
  0x1a   : > { %s104_s23 = scalar_lea.sflag [#allocation3], %s103_s26  ;;  %p122_p2 = scmp.lt.s32.totalorder %s505_s13, 5 }
  0x1b   : > { %306 = dma.hbm_to_vmem [thread:$0]  (!%p304_p0), %s116_s19, 64, %s118_s3, %s104_s23  }
  0x1c   : > { %p123_p4 = pnand %p291_p1, %p122_p2 }
  0x1d   : > { %s607_s18 = sand.u32 (!%p123_p4), 1, %s481_s7  }
  0x1e   : > { %126 = sbr.rel (%p123_p4) target bundleno = 170 (0xaa), region = 24  ;;  %s292_s24 = sshll.u32 (!%p123_p4), %s607_s18, 2 }
  0x1f   : > { %s129_s28 = scalar_lea.sflag (!%p123_p4), [#allocation3], %s607_s18  ;;  %s132_s29 = scalar_lea.vmem (!%p123_p4), [#allocation2], %s292_s24 }
  0x23   : > { %468 = dma.done.wait (%p578_p8), %s129_s28, 64  }
  0x24   : > { %470 = vsyncadd (%p578_p8), %s129_s28, 4294967232  ;;  %vm173_vm0 = vcmask 1043456   ;;  %v152_v0 = vld [vmem:[%s132_s29] sm:$0xf]  ;;  %s295_s20 = sshll.u32 %s493_s10, 1  ;;  %s151_s5 = scalar_lea.vmem [#allocation5], %s292_s24 }
  0x25   : > { %168 = vmatpush.xpose.msra.mxu0 %v152_v0  ;;  %v174_v1 = vsel %vm173_vm0, %v152_v0, 0.0  ;;  %s192_s26 = sadd.s32 %s489_s9, %s295_s20  ;;  %s196_s21 = sshll.u32 %s151_s5, 4  ;;  %vm177_vm1 = vcmask 31744   ;;  %vm179_vm2 = vcmask 35840   ;;  %s197_s21 = int_to_ptr.vmem [resolvable:$true] %s196_s21 }
  0x26   : > { %175 = vadd.xlane.f32.xlu0 %v174_v1  ;;  %s296_s30 = sshll.u32 %s192_s26, 2  ;;  %s182_s15 = scalar_lea.sflag [#allocation4], %s607_s18 }
  0x27   : > { %s194_s4 = scalar_lea.hbm %s660_s1, %s296_s30  ;;  %s427_s24 = scalar_lea.hbm %s660_s1, 16 }
  0x28   : > { %169 = vmatmul.f32.vlgmr.msra.gmra.mxu0 %v152_v0  ;;  %s198_s14 = sshll.u32 %s194_s4, 4  ;;  %s199_s14 = int_to_ptr.hbm [resolvable:$true] %s198_s14 }
  0x29   : > { %s421_s10 = sshra.s32 %s199_s14, 4  ;;  %s422_s10 = int_to_ptr.hbm [resolvable:$true] %s421_s10 }
  0x2a   : > { %s423_s9 = scalar_lea.hbm %s422_s10, 4  ;;  %p428_p7 = scmp.lt.s32.totalorder %s422_s10, %s660_s1 }
  0x2b   : > { %p424_p3 = scmp.ne.s32.totalorder %s422_s10, %s423_s9  ;;  %p429_p8 = scmp.lt.s32.totalorder %s427_s24, %s423_s9 }
  0x2d   : > { %p425_p5 = pnand %p424_p3, %p582_p9  ;;  %p430_p10 = por %p429_p8, %p428_p7 }
  0x2f   : > { %p426_p6 = pneg %p425_p5 }
  0x31   : > { %p431_p11 = pnand %p430_p10, %p426_p6 }
  0x99   : > { %v176_v2 = vpop.xlane.xlu0 %175 }
  0xa5   : > { %v170_v3 = vpop.f32.mrf.mxu0 }
  0xa6   : > { %v178_v4 = vsel %vm177_vm1, %v170_v3, %v176_v2 }
  0xa7   : > { %180 = vst.msk [vmem:[%s151_s5] sm:$0xf] %vm179_vm2, %v178_v4 }
  0xa8   : > { %434 = shalt.err (!%p431_p11)
}
  0xa9   : > { %301 = dma.vmem_to_hbm [thread:$0]  (%p582_p9), %s197_s21, 64, %s199_s14, %s182_s15  }
  0xaa PF: > { %p312_p13 = scmp.ge.s32.totalorder %s505_s13, 2  ;;  %s210_s18 = sand.u32 1, %s477_s6  }
  0xab   : > { %s211_s20 = scalar_lea.sflag [#allocation4], %s210_s18 }
  0xac   : > { %p308_p0 = pnand %p312_p13, %p588_p12 }
  0xae   : > { %p309_p1 = pneg %p308_p0 }
  0xb0   : > { %472 = dma.done.wait (%p309_p1), %s211_s20, 64  }
  0xb1   : > { %474 = vsyncadd (%p309_p1), %s211_s20, 4294967232  ;;  %s17_s13 = sadd.s32 1, %s505_s13   ;;  %s665_s6 = smov %s481_s7 }
  0xb2   : > { %p14_p2 = scmp.ge.s32.totalorder %s17_s13, 6   ;;  %s666_s7 = smov %s485_s8 }
  0xb3   : > { %s667_s8 = smov %s595_s27  ;;  %s668_s9 = smov %s497_s11 }
  0xb4   : > { %s669_s10 = smov %s501_s12  ;;  %s670_s11 = smov %s673_s16 }
  0xb5   : > { %s671_s12 = smov %s677_s17  ;;  %16 = sbr.rel (!%p14_p2) target bundleno = 7 (0x7), region = 69 }
  0xba   :  { %217 = vsyncpa [#allocation3], 1 }
  0xbb   :  { %219 = vsyncpa [#allocation3 + $0x1], 1 }
  0xbc   :  { %220 = vsyncpa [#allocation4], 1 }
  0xbd   :  { %222 = vsyncpa [#allocation4 + $0x1], 1 }

</bundles_post_ra>
